<compile_context>
chip_gen: v5e
topology: v5e:2x2
jax: 0.10.0
libtpu: 0.0.40
codegen_flags: <defaults>
</compile_context>

<pallas_src>
import functools

import jax
import jax.numpy as jnp
from jax.experimental import pallas as pl
from jax.experimental.pallas import tpu as pltpu

LANE = 128


# ----------------------------------------------------------------------------
# Fused Pallas kernel: (im2col patches) @ W + b  ->  InstanceNorm  ->  ReLU
# One grid step == one sample; IN statistics are over the spatial axis.
# ----------------------------------------------------------------------------
def _disc_block_kernel(p_ref, w_ref, b_ref, o_ref, *, normalize, eps):
    # p_ref: (Ho*Wo, K) bf16 patches of one sample
    # w_ref: (K, Cout_pad) bf16   b_ref: (1, Cout_pad) f32
    acc = jnp.dot(p_ref[...], w_ref[...],
                  preferred_element_type=jnp.float32)        # (Ho*Wo, Cout_pad) f32
    acc = acc + b_ref[...]
    if normalize:
        # InstanceNorm2d(affine=False): per-channel mean/var over H*W, biased var.
        mean = jnp.mean(acc, axis=0, keepdims=True)
        cen = acc - mean
        var = jnp.mean(cen * cen, axis=0, keepdims=True)
        acc = cen * jax.lax.rsqrt(var + eps)
    o_ref[...] = jnp.maximum(acc, 0.0)                       # ReLU


# ----------------------------------------------------------------------------
# Deterministic parameter construction (mirrors nn.Conv2d default init bounds).
# Weights are reshaped / lane-padded / cast to bf16 exactly once here.
# ----------------------------------------------------------------------------
def make_disc_block_params(key, in_channels, out_channels, kernel_size=4):
    kw_key, kb_key = jax.random.split(key)
    kh = kw = kernel_size
    fan_in = kh * kw * in_channels
    bound = 1.0 / (fan_in ** 0.5)
    w = jax.random.uniform(kw_key, (kh, kw, in_channels, out_channels),
                           jnp.float32, -bound, bound)       # HWIO
    b = jax.random.uniform(kb_key, (out_channels,), jnp.float32, -bound, bound)

    cout_pad = pl.cdiv(out_channels, LANE) * LANE            # lane-dense output
    wmat = w.reshape(kh * kw * in_channels, out_channels)
    wmat = jnp.pad(wmat, ((0, 0), (0, cout_pad - out_channels))).astype(jnp.bfloat16)
    bias = jnp.pad(b, (0, cout_pad - out_channels)).reshape(1, cout_pad)  # f32

    return {"wmat": wmat, "bias": bias, "out_channels": out_channels,
            "kernel_size": kernel_size, "stride": 2, "padding": 1}


# ----------------------------------------------------------------------------
# DiscBlock forward.  Public layout NCHW (PyTorch); internal layout NHWC.
# ----------------------------------------------------------------------------
def disc_block_forward(params, x_nchw, *, normalize=True, eps=1e-5):
    kh = kw = params["kernel_size"]
    stride = params["stride"]
    pad = params["padding"]
    wmat = params["wmat"]
    bias = params["bias"]
    cout = params["out_channels"]
    cout_pad = wmat.shape[1]

    n, cin, h, w = x_nchw.shape
    ho = (h + 2 * pad - kh) // stride + 1
    wo = (w + 2 * pad - kw) // stride + 1
    hwo = ho * wo
    K = kh * kw * cin

    # ---- JAX glue: NCHW -> NHWC, zero pad, strided im2col, cast to bf16 ----
    x = jnp.transpose(x_nchw, (0, 2, 3, 1)).astype(jnp.float32)
    xp = jnp.pad(x, ((0, 0), (pad, pad), (pad, pad), (0, 0)))
    slices = []
    for ih in range(kh):
        for iw in range(kw):
            slices.append(xp[:, ih:ih + (ho - 1) * stride + 1:stride,
                              iw:iw + (wo - 1) * stride + 1:stride, :])
    patches = jnp.concatenate(slices, axis=-1)               # (N, Ho, Wo, K)
    patches = patches.reshape(n, hwo, K).astype(jnp.bfloat16)
    # TODO(synk): for large images, build the im2col tile inside the kernel
    # from shifted VMEM slices and chunk the H*W axis of the IN reduction
    # (two-pass mean/var) so per-sample blocks fit v7x's 64 MiB VMEM.

    cost = pl.CostEstimate(
        flops=2 * n * hwo * K * cout_pad,
        transcendentals=0,
        bytes_accessed=(patches.size * 2 + wmat.size * 2 + bias.size * 4
                        + n * hwo * cout_pad * 4))

    out = pl.pallas_call(
        functools.partial(_disc_block_kernel, normalize=normalize, eps=eps),
        out_shape=jax.ShapeDtypeStruct((n, hwo, cout_pad), jnp.float32),
        grid=(n,),
        in_specs=[
            pl.BlockSpec((None, hwo, K), lambda i: (i, 0, 0)),       # per-sample patches
            pl.BlockSpec((K, cout_pad), lambda i: (0, 0)),           # resident weights
            pl.BlockSpec((1, cout_pad), lambda i: (0, 0)),           # resident bias
        ],
        out_specs=pl.BlockSpec((None, hwo, cout_pad), lambda i: (i, 0, 0)),
        compiler_params=pltpu.CompilerParams(
            dimension_semantics=("parallel",)),
        cost_estimate=cost,
    )(patches, wmat, bias)

    out = out[:, :, :cout].reshape(n, ho, wo, cout)          # drop lane padding
    return jnp.transpose(out, (0, 3, 1, 2))                  # NHWC -> NCHW


# ----------------------------------------------------------------------------
if __name__ == "__main__":
    key = jax.random.PRNGKey(0)
    k_x, k_p = jax.random.split(key)

    batch, in_channels, out_channels, hw = 2, 4, 32, 16
    x = jax.random.normal(k_x, (batch, in_channels, hw, hw), dtype=jnp.float32)
    params = make_disc_block_params(k_p, in_channels, out_channels)

    out = disc_block_forward(params, x)          # normalize=True (module default)
    out = jax.block_until_ready(out)

    assert out.shape == (batch, out_channels, hw // 2, hw // 2), out.shape
    assert bool(jnp.all(jnp.isfinite(out)))
    assert bool(jnp.all(out >= 0.0))             # ReLU output is non-negative
    print("KERNEL_OK")
</pallas_src>

<mosaic_0001>
module attributes {stable_mosaic.version = 11 : i64} {
  func.func @_disc_block_kernel(%arg0: i32, %arg1: memref<1x64x64xbf16, #tpu.memory_space<vmem>>, %arg2: memref<64x128xbf16, #tpu.memory_space<vmem>>, %arg3: memref<1x128xf32, #tpu.memory_space<vmem>>, %arg4: memref<1x64x128xf32, #tpu.memory_space<vmem>>) attributes {dimension_semantics = [#tpu.dimension_semantics<parallel>], iteration_bounds = array<i64: 2>, scalar_prefetch = 0 : i64, scratch_operands = 0 : i64, tpu.core_type = #tpu.core_type<tc>, window_params = [{transform_indices = @transform_0, window_bounds = array<i64: 1, 64, 64>}, {pipeline_mode = #tpu.pipeline_mode<synchronous>, transform_indices = @transform_1, window_bounds = array<i64: 64, 128>}, {pipeline_mode = #tpu.pipeline_mode<synchronous>, transform_indices = @transform_2, window_bounds = array<i64: 1, 128>}, {transform_indices = @transform_3, window_bounds = array<i64: 1, 64, 128>}]} {
    %c0 = arith.constant 0 : index
    %c0_0 = arith.constant 0 : index
    %c0_1 = arith.constant 0 : index
    %0 = vector.load %arg1[%c0, %c0_0, %c0_1] : memref<1x64x64xbf16, #tpu.memory_space<vmem>>, vector<1x64x64xbf16>
    %1 = vector.shape_cast %0 : vector<1x64x64xbf16> to vector<64x64xbf16>
    %c0_2 = arith.constant 0 : index
    %c0_3 = arith.constant 0 : index
    %2 = vector.load %arg2[%c0_2, %c0_3] : memref<64x128xbf16, #tpu.memory_space<vmem>>, vector<64x128xbf16>
    %cst = arith.constant dense<0.000000e+00> : vector<64x128xf32>
    %3 = tpu.matmul %1, %2, %cst {dimension_numbers = #tpu.dot_dimension_numbers<[1], [0], [0], [1], [0, 0, 1, 1], [], []>} : vector<64x64xbf16>, vector<64x128xbf16>, vector<64x128xf32> -> vector<64x128xf32>
    %c0_4 = arith.constant 0 : index
    %c0_5 = arith.constant 0 : index
    %4 = vector.load %arg3[%c0_4, %c0_5] : memref<1x128xf32, #tpu.memory_space<vmem>>, vector<1x128xf32>
    %5 = vector.broadcast %4 : vector<1x128xf32> to vector<64x128xf32>
    %6 = arith.addf %3, %5 : vector<64x128xf32>
    %cst_6 = arith.constant dense<0.000000e+00> : vector<128xf32>
    %7 = vector.multi_reduction <add>, %6, %cst_6 [0] : vector<64x128xf32> to vector<128xf32>
    %8 = vector.shape_cast %7 : vector<128xf32> to vector<1x128xf32>
    %cst_7 = arith.constant 6.400000e+01 : f32
    %9 = vector.broadcast %cst_7 : f32 to vector<1x128xf32>
    %10 = arith.divf %8, %9 : vector<1x128xf32>
    %11 = vector.broadcast %10 : vector<1x128xf32> to vector<64x128xf32>
    %12 = arith.subf %6, %11 : vector<64x128xf32>
    %13 = arith.mulf %12, %12 : vector<64x128xf32>
    %cst_8 = arith.constant dense<0.000000e+00> : vector<128xf32>
    %14 = vector.multi_reduction <add>, %13, %cst_8 [0] : vector<64x128xf32> to vector<128xf32>
    %15 = vector.shape_cast %14 : vector<128xf32> to vector<1x128xf32>
    %cst_9 = arith.constant 6.400000e+01 : f32
    %16 = vector.broadcast %cst_9 : f32 to vector<1x128xf32>
    %17 = arith.divf %15, %16 : vector<1x128xf32>
    %cst_10 = arith.constant 9.99999974E-6 : f32
    %18 = vector.broadcast %cst_10 : f32 to vector<1x128xf32>
    %19 = arith.addf %17, %18 : vector<1x128xf32>
    %20 = math.rsqrt %19 : vector<1x128xf32>
    %21 = vector.broadcast %20 : vector<1x128xf32> to vector<64x128xf32>
    %22 = arith.mulf %12, %21 : vector<64x128xf32>
    %cst_11 = arith.constant 0.000000e+00 : f32
    %23 = vector.broadcast %cst_11 : f32 to vector<64x128xf32>
    %24 = arith.maximumf %22, %23 : vector<64x128xf32>
    %c0_12 = arith.constant 0 : index
    %c0_13 = arith.constant 0 : index
    %c0_14 = arith.constant 0 : index
    %25 = vector.load %arg4[%c0_12, %c0_13, %c0_14] : memref<1x64x128xf32, #tpu.memory_space<vmem>>, vector<1x64x128xf32>
    %26 = vector.shape_cast %25 : vector<1x64x128xf32> to vector<64x128xf32>
    %27 = vector.shape_cast %24 : vector<64x128xf32> to vector<1x64x128xf32>
    tpu.vector_store %arg4[%c0_12, %c0_13, %c0_14], %27 {strides = array<i32>} : memref<1x64x128xf32, #tpu.memory_space<vmem>>, vector<1x64x128xf32>,
    return
  }
  func.func @transform_0(%arg0: i32) -> (i32, i32, i32) {
    %c0_i32 = arith.constant 0 : i32
    %c0_i32_0 = arith.constant 0 : i32
    %c0_i32_1 = arith.constant 0 : i32
    return %arg0, %c0_i32, %c0_i32_0 : i32, i32, i32
  }
  func.func @transform_1(%arg0: i32) -> (i32, i32) {
    %c0_i32 = arith.constant 0 : i32
    %c0_i32_0 = arith.constant 0 : i32
    %c0_i32_1 = arith.constant 0 : i32
    return %c0_i32, %c0_i32_0 : i32, i32
  }
  func.func @transform_2(%arg0: i32) -> (i32, i32) {
    %c0_i32 = arith.constant 0 : i32
    %c0_i32_0 = arith.constant 0 : i32
    %c0_i32_1 = arith.constant 0 : i32
    return %c0_i32, %c0_i32_0 : i32, i32
  }
  func.func @transform_3(%arg0: i32) -> (i32, i32, i32) {
    %c0_i32 = arith.constant 0 : i32
    %c0_i32_0 = arith.constant 0 : i32
    %c0_i32_1 = arith.constant 0 : i32
    return %arg0, %c0_i32, %c0_i32_0 : i32, i32, i32
  }
}

</mosaic_0001>

<bundles_post_ra>
// kernel: tpu_custom_call.1
= control target key start
LH: loop header
LB: loop body
LE: loop exit
PB: predicated region body
PF: predicated region fallthrough
CT: control target
= control target key end

     0   :  { %8 = vsyncpa [#allocation3], 0  ;;  %s947_s0 = inlined_call_operand.hbm [shape: bf16[2,64,64], index: 0, kind: input, shape index: {}]   ;;  %s948_s1 = inlined_call_operand.hbm [shape: bf16[64,128], index: 1, kind: input, shape index: {}]   ;;  %s949_s2 = inlined_call_operand.vmem [shape: f32[1,128], index: 2, kind: input, shape index: {}]   ;;  %s950_s3 = inlined_call_operand.hbm [shape: f32[2,64,128], index: 3, kind: output, shape index: {}]  }
   0x1   :  { %10 = vsyncpa [#allocation3 + $0x1], 0 }
   0x2   :  { %11 = vsyncpa [#allocation6], 0 }
   0x3   :  { %12 = vsyncpa [#allocation4], 0 }
   0x4   :  { %14 = vsyncpa [#allocation4 + $0x1], 0  ;;  %s799_s12 = smov 0   ;;  %s801_s13 = smov 0  }
   0x5   :  { %s803_s14 = smov 0   ;;  %s805_s15 = smov 0  }
   0x6 LB: > { %s820_s16 = sadd.s32 4294967295, %s771_s15   ;;  %s500_s17 = sadd.s32 4294967294, %s771_s15   ;;  %s771_s15 = sphi %s805_s15, %s960_s15   ;;  %s767_s14 = sphi %s803_s14, %s959_s14   ;;  %s763_s13 = sphi %s801_s13, %s958_s13   ;;  %s759_s12 = sphi %s799_s12, %s957_s12  }
   0x7   : > { %p40_p0 = scmp.ne.s32.totalorder %s763_s13, %s759_s12  ;;  %p41_p1 = scmp.eq.s32.totalorder %s820_s16, 0 }
   0x8   : > { %p106_p2 = scmp.eq.s32.totalorder %s820_s16, 1  ;;  %p112_p3 = scmp.eq.s32.totalorder %s500_s17, 1 }
   0x9   : > { %p829_p4 = por %p41_p1, %p40_p0  ;;  %p501_p5 = scmp.ge.s32.totalorder %s771_s15, 1 }
   0xa   : > { %p834_p6 = por %p112_p3, %p40_p0  ;;  %p119_p7 = scmp.lt.s32.totalorder %s771_s15, 3 }
   0xb   : > { %s130_s22 = sshll.u32 %s948_s1, 4  ;;  %s773_s24 = smov [#allocation5]   ;;  %s131_s22 = int_to_ptr.hbm [resolvable:$true] %s130_s22 }
   0xc   : > { %p842_p8 = pnand %p501_p5, %p119_p7  ;;  %s132_s25 = sshll.u32 %s773_s24, 4  ;;  %s133_s25 = int_to_ptr.vmem [resolvable:$true] %s132_s25 }
   0xd   : > { %s852_s26 = sadd.s32 1, %s771_s15   ;;  %s774_s27 = smov 64  }
   0xe   : > { %p582_p9 = pneg %p842_p8  ;;  %s775_s28 = smov 4  }
   0xf   : > { %s24_s29 = ssub.s32 %s771_s15, %s852_s26  ;;  %s27_s30 = sadd.s32 1, %s767_s14 }
  0x10   : > { %p583_p10 = pnand %p582_p9, %p41_p1  ;;  %p25_p12 = scmp.eq.s32.totalorder %s24_s29, 0 }
  0x11   : > { %p34_p13 = scmp.ne.s32.totalorder %s767_s14, %s763_s13  ;;  %p35_p0 = scmp.eq.s32.totalorder %s771_s15, 0 }
  0x12   : > { %585 = dma.hbm_to_vmem [thread:$0]  (!%p583_p10), %s131_s22, 512, %s133_s25, [#allocation6], %s774_s27, %s774_s27, %s775_s28  }
  0x13   : > { %s864_s4 = scalar_select %p25_p12, %s767_s14, %s27_s30  }
  0x14   : > { %p868_p3 = por %p106_p2, %p34_p13  ;;  %p595_p5 = scmp.lt.s32.totalorder %s771_s15, 2 }
  0x15   : > { %s149_s6 = sand.u32 1, %s767_s14   ;;  %s552_s7 = sshll.u32 %s771_s15, 5 }
  0x16   : > { %p36_p7 = por %p35_p0, %p34_p13  ;;  %s504_s8 = sshll.u32 %s149_s6, 5 }
  0x17   : > { %s158_s11 = scalar_lea.hbm %s947_s0, %s552_s7  ;;  %s153_s20 = scalar_lea.vmem [#allocation2], %s504_s8 }
  0x18   : > { %s159_s17 = sshll.u32 %s158_s11, 4  ;;  %s161_s21 = sshll.u32 %s153_s20, 4  ;;  %s160_s17 = int_to_ptr.hbm [resolvable:$true] %s159_s17  ;;  %s162_s21 = int_to_ptr.vmem [resolvable:$true] %s161_s21 }
  0x19   : > { %p878_p9 = pnand %p595_p5, %p36_p7  ;;  %s150_s24 = scalar_lea.sflag [#allocation3], %s149_s6 }
  0x1a   : > { %s671_s25 = sshra.s32 %s160_s17, 4  ;;  %s678_s8 = scalar_lea.hbm %s947_s0, 64  ;;  %s672_s25 = int_to_ptr.hbm [resolvable:$true] %s671_s25 }
  0x1b   : > { %s673_s29 = scalar_lea.hbm %s672_s25, 32  ;;  %p675_p10 = pneg %p878_p9 }
  0x1c   : > { %p674_p2 = scmp.ne.s32.totalorder %s672_s25, %s673_s29  ;;  %p679_p0 = scmp.lt.s32.totalorder %s672_s25, %s947_s0 }
  0x1d   : > { %p680_p5 = scmp.lt.s32.totalorder %s678_s8, %s673_s29 }
  0x1e   : > { %p676_p12 = pnand %p675_p10, %p674_p2 }
  0x1f   : > { %p681_p7 = por %p680_p5, %p679_p0 }
  0x20   : > { %p677_p13 = pneg %p676_p12 }
  0x22   : > { %p682_p11 = pnand %p681_p7, %p677_p13 }
  0x24   : > { %685 = shalt.err (!%p682_p11)
}
  0x25   : > { %589 = dma.hbm_to_vmem [thread:$0]  (!%p878_p9), %s160_s17, 512, %s162_s21, %s150_s24, %s774_s27, %s774_s27, %s775_s28  }
  0x26   : > { %173 = sbr.rel (%p842_p8) target bundleno = 293 (0x125), region = 32  ;;  %s898_s6 = sand.u32 (!%p842_p8), 1, %s763_s13  }
  0x27   : > { %s508_s11 = sshll.u32 (!%p842_p8), %s898_s6, 5  ;;  %s176_s20 = scalar_lea.sflag (!%p842_p8), [#allocation3], %s898_s6 }
  0x28   : > { %s179_s25 = scalar_lea.vmem (!%p842_p8), [#allocation2], %s508_s11 }
  0x2b   : > { %746 = dma.done.wait (%p829_p4), %s176_s20, 512  }
  0x2c   : > { %748 = vsyncadd (%p829_p4), %s176_s20, 4294966784 }
  0x2d   : > { %750 = dma.done.wait (%p41_p1), [#allocation6], 512  }
  0x2e   : > { %752 = vsyncadd (%p41_p1), [#allocation6], 4294966784  ;;  %v560_v0 = vld [vmem:[#allocation5 + $0x18] sm:$0xff]  ;;  %v559_v1 = vld [vmem:[#allocation5 + $0x10] sm:$0xff]  ;;  %vm273_vm0 = vcmask 523264   ;;  %v776_v16 = vmov 64.0  }
  0x2f   : > { %290 = vmatpush.bf16.msra.mxu0 %v560_v0  ;;  %562 = vmatpush.bf16.msra.mxu1 %v560_v0  ;;  %v558_v2 = vld [vmem:[#allocation5 + $0x8] sm:$0xff]  ;;  %v557_v3 = vld [vmem:[#allocation5] sm:$0xff]  ;;  %v555_v6 = vld [vmem:[%s179_s25 + $0x10] sm:$0xff]  ;;  %637 = vrcp.f32 %v776_v16  ;;  %s510_s27 = sshll.u32 %s898_s6, 6  ;;  %s561_s28 = sshll.u32 %s820_s16, 6 }
  0x30   : > { %563 = vmatpush.bf16.msra.mxu2 %v560_v0  ;;  %564 = vmatpush.bf16.msra.mxu3 %v560_v0  ;;  %v553_v4 = vld [vmem:[%s179_s25] sm:$0xff]  ;;  %v554_v5 = vld [vmem:[%s179_s25 + $0x8] sm:$0xff]  ;;  %v556_v7 = vld [vmem:[%s179_s25 + $0x18] sm:$0xff]  ;;  %s413_s22 = scalar_lea.hbm %s950_s3, %s561_s28  ;;  %s207_s24 = scalar_lea.vmem [#allocation7], %s510_s27 }
  0x31   : > { %v636_v10 = vld [vmem:[%s949_s2] ss:$0 sm:$0xff]  ;;  %s414_s16 = sshll.u32 %s207_s24, 4  ;;  %s416_s29 = sshll.u32 %s413_s22, 4  ;;  %s415_s16 = int_to_ptr.vmem [resolvable:$true] %s414_s16  ;;  %s417_s29 = int_to_ptr.hbm [resolvable:$true] %s416_s29 }
  0x32   : > { %s402_s30 = scalar_lea.sflag [#allocation4], %s898_s6  ;;  %s715_s7 = sshra.s32 %s417_s29, 4  ;;  %s716_s7 = int_to_ptr.hbm [resolvable:$true] %s715_s7 }
  0x33   : > { %291 = vmatpush.bf16.msra.mxu0 %v559_v1  ;;  %565 = vmatpush.bf16.msra.mxu1 %v559_v1  ;;  %s717_s8 = scalar_lea.hbm %s716_s7, 64  ;;  %s721_s11 = scalar_lea.hbm %s950_s3, 128 }
  0x34   : > { %566 = vmatpush.bf16.msra.mxu2 %v559_v1  ;;  %567 = vmatpush.bf16.msra.mxu3 %v559_v1  ;;  %p718_p1 = scmp.ne.s32.totalorder %s716_s7, %s717_s8  ;;  %p722_p11 = scmp.lt.s32.totalorder %s716_s7, %s950_s3 }
  0x35   : > { %v638_v22 = vpop.eup %637  ;;  %p723_p9 = scmp.lt.s32.totalorder %s721_s11, %s717_s8 }
  0x36   : > { %v329_v29 = vmul.f32 64.0, %v638_v22  ;;  %vm333_vm1 = vweird.f32 %v638_v22  ;;  %p719_p4 = pnand %p718_p1, %p868_p3 }
  0x37   : > { %292 = vmatpush.bf16.msra.mxu0 %v558_v2  ;;  %568 = vmatpush.bf16.msra.mxu1 %v558_v2  ;;  %p724_p2 = por %p723_p9, %p722_p11 }
  0x38   : > { %569 = vmatpush.bf16.msra.mxu2 %v558_v2  ;;  %570 = vmatpush.bf16.msra.mxu3 %v558_v2  ;;  %v330_v34 = vsub.f32 1.0, %v329_v29  ;;  %p720_p8 = pneg %p719_p4 }
  0x3a   : > { %v331_v37 = vmul.f32 %v638_v22, %v330_v34  ;;  %p725_p10 = pnand %p724_p2, %p720_p8 }
  0x3b   : > { %293 = vmatpush.bf16.msra.mxu0 %v557_v3  ;;  %571 = vmatpush.bf16.msra.mxu1 %v557_v3 }
  0x3c   : > { %572 = vmatpush.bf16.msra.mxu2 %v557_v3  ;;  %573 = vmatpush.bf16.msra.mxu3 %v557_v3  ;;  %v332_v40 = vadd.f32 %v638_v22, %v331_v37 }
  0x3e   : > { %543 = vmatmul.msk.bf16.vlgmr.msra.gmra.mxu0 %vm273_vm0, %v553_v4  ;;  %544 = vmatmul.msk.bf16.vlgmr.msra.gmra.mxu1 %vm273_vm0, %v554_v5  ;;  %v334_v43 = vsel %vm333_vm1, %v638_v22, %v332_v40 }
  0x3f   : > { %545 = vmatmul.msk.bf16.vlgmr.msra.gmra.mxu2 %vm273_vm0, %v555_v6  ;;  %546 = vmatmul.msk.bf16.vlgmr.msra.gmra.mxu3 %vm273_vm0, %v556_v7 }
  0xbb   : > { %v295_v8 = vpop.f32.mrf.mxu0  ;;  %v300_v9 = vpop.f32.mrf.mxu1 }
  0xbc   : > { %v296_v14 = vadd.f32 %v636_v10, %v295_v8  ;;  %v301_v18 = vadd.f32 %v636_v10, %v300_v9 }
  0xc2   : > { %v305_v11 = vpop.f32.mrf.mxu2  ;;  %v310_v12 = vpop.f32.mrf.mxu3 }
  0xc3   : > { %v297_v13 = vpop.f32.mrf.mxu0  ;;  %v302_v17 = vpop.f32.mrf.mxu1  ;;  %v306_v23 = vadd.f32 %v636_v10, %v305_v11  ;;  %v311_v30 = vadd.f32 %v636_v10, %v310_v12 }
  0xc4   : > { %v298_v15 = vadd.f32 %v636_v10, %v297_v13  ;;  %v303_v20 = vadd.f32 %v636_v10, %v302_v17 }
  0xc6   : > { %v315_v19 = vadd.f32 %v298_v15, %v296_v14 }
  0xc8   : > { %v316_v21 = vadd.f32 %v315_v19, %v301_v18 }
  0xca   : > { %v317_v24 = vadd.f32 %v316_v21, %v303_v20  ;;  %v307_v25 = vpop.f32.mrf.mxu2  ;;  %v312_v28 = vpop.f32.mrf.mxu3 }
  0xcb   : > { %v308_v26 = vadd.f32 %v636_v10, %v307_v25  ;;  %v313_v32 = vadd.f32 %v636_v10, %v312_v28 }
  0xcc   : > { %v318_v27 = vadd.f32 %v317_v24, %v306_v23 }
  0xce   : > { %v319_v31 = vadd.f32 %v318_v27, %v308_v26 }
  0xd0   : > { %v320_v33 = vadd.f32 %v319_v31, %v311_v30 }
  0xd2   : > { %v321_v35 = vadd.f32 %v320_v33, %v313_v32 }
  0xd4   : > { %v322_v36 = vrot.slane %v321_v35, 4 }
  0xd6   : > { %v323_v38 = vadd.f32 %v322_v36, %v321_v35 }
  0xd8   : > { %v324_v39 = vrot.slane %v323_v38, 2 }
  0xda   : > { %v325_v41 = vadd.f32 %v324_v39, %v323_v38 }
  0xdc   : > { %v326_v42 = vrot.slane %v325_v41, 1 }
  0xde   : > { %v327_v44 = vadd.f32 %v326_v42, %v325_v41 }
  0xe0   : > { %v335_v45 = vmul.f32 %v334_v43, %v327_v44 }
  0xe2   : > { %v336_v46 = vsub.f32 %v296_v14, %v335_v45  ;;  %v337_v47 = vsub.f32 %v298_v15, %v335_v45  ;;  %v338_v48 = vsub.f32 %v301_v18, %v335_v45  ;;  %v339_v49 = vsub.f32 %v303_v20, %v335_v45 }
  0xe3   : > { %v340_v52 = vsub.f32 %v306_v23, %v335_v45  ;;  %v341_v55 = vsub.f32 %v308_v26, %v335_v45  ;;  %v342_v58 = vsub.f32 %v311_v30, %v335_v45  ;;  %v343_v61 = vsub.f32 %v313_v32, %v335_v45 }
  0xe4   : > { %v344_v50 = vmul.f32 %v336_v46, %v336_v46  ;;  %v345_v51 = vmul.f32 %v337_v47, %v337_v47  ;;  %v346_v53 = vmul.f32 %v338_v48, %v338_v48  ;;  %v347_v56 = vmul.f32 %v339_v49, %v339_v49 }
  0xe5   : > { %v348_v59 = vmul.f32 %v340_v52, %v340_v52  ;;  %v349_v62 = vmul.f32 %v341_v55, %v341_v55  ;;  %v350_v0 = vmul.f32 %v342_v58, %v342_v58  ;;  %v351_v2 = vmul.f32 %v343_v61, %v343_v61 }
  0xe6   : > { %v352_v54 = vadd.f32 %v345_v51, %v344_v50 }
  0xe8   : > { %v353_v57 = vadd.f32 %v352_v54, %v346_v53 }
  0xea   : > { %v354_v60 = vadd.f32 %v353_v57, %v347_v56 }
  0xec   : > { %v355_v63 = vadd.f32 %v354_v60, %v348_v59 }
  0xee   : > { %v356_v1 = vadd.f32 %v355_v63, %v349_v62 }
  0xf0   : > { %v357_v3 = vadd.f32 %v356_v1, %v350_v0 }
  0xf2   : > { %v358_v4 = vadd.f32 %v357_v3, %v351_v2 }
  0xf4   : > { %v359_v5 = vrot.slane %v358_v4, 4 }
  0xf6   : > { %v360_v6 = vadd.f32 %v359_v5, %v358_v4 }
  0xf8   : > { %v361_v7 = vrot.slane %v360_v6, 2 }
  0xfa   : > { %v362_v8 = vadd.f32 %v361_v7, %v360_v6 }
  0xfc   : > { %v363_v9 = vrot.slane %v362_v8, 1 }
  0xfe   : > { %v364_v10 = vadd.f32 %v363_v9, %v362_v8 }
 0x100   : > { %v365_v11 = vmul.f32 %v364_v10, %v334_v43 }
 0x102   : > { %v366_v12 = vadd.f32 1e-05, %v365_v11 }
 0x104   : > { %639 = vrsqrt.f32 %v366_v12  ;;  %vm373_vm3 = vweird.f32 %v366_v12 }
 0x10a   : > { %v640_v13 = vpop.eup %639 }
 0x10b   : > { %v368_v14 = vmul.f32 %v640_v13, %v366_v12  ;;  %vm374_vm2 = vweird.f32 %v640_v13 }
 0x10c   : > { %vm375_vm4 = vmor %vm373_vm3, %vm374_vm2 }
 0x10d   : > { %v369_v15 = vmul.f32 %v640_v13, %v368_v14 }
 0x10f   : > { %v370_v16 = vmul.f32 0.5, %v369_v15 }
 0x111   : > { %v371_v17 = vsub.f32 1.5, %v370_v16 }
 0x113   : > { %v372_v18 = vmul.f32 %v640_v13, %v371_v17 }
 0x115   : > { %v376_v19 = vsel %vm375_vm4, %v640_v13, %v372_v18 }
 0x116   : > { %v377_v20 = vmul.f32 %v376_v19, %v336_v46  ;;  %v378_v21 = vmul.f32 %v376_v19, %v337_v47  ;;  %v379_v22 = vmul.f32 %v376_v19, %v338_v48  ;;  %v380_v23 = vmul.f32 %v376_v19, %v339_v49 }
 0x117   : > { %v381_v24 = vmul.f32 %v376_v19, %v340_v52  ;;  %v382_v25 = vmul.f32 %v376_v19, %v341_v55  ;;  %v383_v26 = vmul.f32 %v376_v19, %v342_v58  ;;  %v384_v30 = vmul.f32 %v376_v19, %v343_v61 }
 0x118   : > { %v385_v27 = vmax.f32 %v377_v20, 0.0  ;;  %v386_v28 = vmax.f32 %v378_v21, 0.0  ;;  %v387_v29 = vmax.f32 %v379_v22, 0.0  ;;  %v388_v31 = vmax.f32 %v380_v23, 0.0 }
 0x119   : > { %v389_v32 = vmax.f32 %v381_v24, 0.0  ;;  %v390_v33 = vmax.f32 %v382_v25, 0.0  ;;  %v391_v34 = vmax.f32 %v383_v26, 0.0  ;;  %v392_v35 = vmax.f32 %v384_v30, 0.0 }
 0x11a   : > { %393 = vst [vmem:[%s207_s24] sm:$0xff] %v385_v27 }
 0x11b   : > { %394 = vst [vmem:[%s207_s24 + $0x8] sm:$0xff] %v386_v28 }
 0x11c   : > { %395 = vst [vmem:[%s207_s24 + $0x10] sm:$0xff] %v387_v29 }
 0x11d   : > { %396 = vst [vmem:[%s207_s24 + $0x18] sm:$0xff] %v388_v31 }
 0x11e   : > { %397 = vst [vmem:[%s207_s24 + $0x20] sm:$0xff] %v389_v32 }
 0x11f   : > { %398 = vst [vmem:[%s207_s24 + $0x28] sm:$0xff] %v390_v33 }
 0x120   : > { %399 = vst [vmem:[%s207_s24 + $0x30] sm:$0xff] %v391_v34 }
 0x121   : > { %400 = vst [vmem:[%s207_s24 + $0x38] sm:$0xff] %v392_v35 }
 0x122   : > { %728 = shalt.err (!%p725_p10)
}
 0x123   : > { %s777_s6 = smov 128   ;;  %s778_s18 = smov 8  }
 0x124   : > { %580 = dma.vmem_to_hbm [thread:$0]  (%p868_p3), %s415_s16, 1024, %s417_s29, %s402_s30, %s777_s6, %s777_s6, %s778_s18  }
 0x125 PF: > { %s431_s23 = sand.u32 1, %s759_s12   ;;  %p956_p12 = scmp.ge.s32.totalorder %s771_s15, 2 }
 0x126   : > { %s432_s27 = scalar_lea.sflag [#allocation4], %s431_s23 }
 0x127   : > { %p591_p13 = pnand %p956_p12, %p834_p6 }
 0x129   : > { %p592_p0 = pneg %p591_p13 }
 0x12b   : > { %754 = dma.done.wait (%p592_p0), %s432_s27, 1024  }
 0x12c   : > { %756 = vsyncadd (%p592_p0), %s432_s27, 4294966272  ;;  %p17_p5 = scmp.ge.s32.totalorder %s852_s26, 4   ;;  %s957_s12 = smov %s763_s13 }
 0x12d   : > { %s958_s13 = smov %s767_s14  ;;  %s959_s14 = smov %s864_s4 }
 0x12e   : > { %s960_s15 = smov %s852_s26  ;;  %19 = sbr.rel (!%p17_p5) target bundleno = 6 (0x6), region = 81 }
 0x133   :  { %438 = vsyncpa [#allocation3], 1 }
 0x134   :  { %440 = vsyncpa [#allocation3 + $0x1], 1 }
 0x135   :  { %441 = vsyncpa [#allocation6], 1 }
 0x136   :  { %442 = vsyncpa [#allocation4], 1 }
 0x137   :  { %444 = vsyncpa [#allocation4 + $0x1], 1 }

</bundles_post_ra>
